<compile_context>
chip_gen: v7x
topology: tpu7x:2x2x1
jax: 0.10.0
libtpu: 0.0.40
codegen_flags: <defaults>
</compile_context>

<pallas_src>
import jax
import jax.numpy as jnp
from jax.experimental import pallas as pl
from jax.experimental.pallas import tpu as pltpu


def _copy_kernel(x_ref, o_ref):
    # Straight copy of the current (row_tile, C) block. Mem-bound; no compute.
    o_ref[...] = x_ref[...]


def _pow2_floor(n: int) -> int:
    n = int(n)
    return 1 << (n.bit_length() - 1) if n >= 1 else 1


def _vmem_capacity_bytes() -> int:
    # Generation-aware VMEM size (64 MiB/TC on v7x, 128 MiB on v5e/v6e).
    try:
        return int(pltpu.get_tpu_info().vmem_capacity_bytes)
    except Exception:
        return 64 * 1024 * 1024  # conservative fallback (v7x per-TC)


def _choose_copy_view(total: int, size: int, rows: int):
    """Pick a lane-dense (R, C) 2D view of the flat element stream to copy."""
    if total % 128 == 0:
        # Largest C = 128*m (m <= 256 -> C <= 32768) that divides `total`.
        q = total // 128
        m_max = min(q, 256)
        for m in range(m_max, 0, -1):
            if q % m == 0:
                C = 128 * m
                return total // C, C
    # TODO(synk): if total % 128 != 0 AND size is huge, a column tile would be
    # needed to bound VMEM; fall back to the full-extent last dim (correct,
    # possibly masked stores).
    return rows, size


def reshape_forward(x: jax.Array, size: int) -> jax.Array:
    """Equivalent of torch: x.view(-1, size), with the copy done in Pallas."""
    total = int(x.size)
    assert total % size == 0, "total number of elements must be divisible by size"
    rows = total // size

    dtype_bytes = jnp.dtype(x.dtype).itemsize

    # Lane-dense copy view (R, C); element order is identical to the
    # row-major (rows, size) view, so the final reshape is metadata-only.
    R, C = _choose_copy_view(total, size, rows)
    x2d = jnp.reshape(x, (R, C))

    # --- VMEM-budgeted tile selection -------------------------------------
    vmem_cap = _vmem_capacity_bytes()
    # Per-block budget: 4 live blocks at once (double-buffered input + output).
    block_budget = min(vmem_cap, 128 * 1024 * 1024) // 16  # 4 MiB v7x, 8 MiB v5e/v6e
    vmem_limit = min(vmem_cap // 2, 64 * 1024 * 1024)

    bytes_per_row = C * dtype_bytes
    row_tile = _pow2_floor(max(1, block_budget // max(1, bytes_per_row)))
    row_tile = max(8, row_tile)          # at least a full sublane tile
    row_tile = min(row_tile, R)          # never exceed the array
    # Keep >= 2 grid steps when the array allows it (v7x megacore sharding).
    if R >= 16 and row_tile == R:
        row_tile = max(8, _pow2_floor(R // 2))

    grid = (pl.cdiv(R, row_tile),)

    out2d = pl.pallas_call(
        _copy_kernel,
        out_shape=jax.ShapeDtypeStruct((R, C), x.dtype),
        grid_spec=pltpu.PrefetchScalarGridSpec(
            num_scalar_prefetch=0,
            grid=grid,
            in_specs=[pl.BlockSpec((row_tile, C), lambda i: (i, 0))],
            out_specs=pl.BlockSpec((row_tile, C), lambda i: (i, 0)),
        ),
        compiler_params=pltpu.CompilerParams(
            dimension_semantics=("parallel",),
            vmem_limit_bytes=int(vmem_limit),
        ),
    )(x2d)

    # Metadata-only reshape to the user-visible (-1, size) shape.
    return jnp.reshape(out2d, (rows, size))


if __name__ == "__main__":
    key = jax.random.PRNGKey(0)
    # Small NCHW input: batch=2, channels=4, spatial=16x16 -> 2048 elements.
    x = jax.random.normal(key, (2, 4, 16, 16), dtype=jnp.float32)

    # Case 1: size that is a multiple of 128 -> (16, 128) output.
    size = 128
    y = jax.block_until_ready(reshape_forward(x, size))
    ref = jnp.reshape(x, (-1, size))
    assert y.shape == ref.shape and y.dtype == ref.dtype
    assert bool(jnp.array_equal(y, ref))

    # Case 2: small size (< 128) -> lane-dense flat copy + metadata reshape.
    size2 = 32
    y2 = jax.block_until_ready(reshape_forward(x, size2))
    ref2 = jnp.reshape(x, (-1, size2))
    assert y2.shape == ref2.shape and y2.dtype == ref2.dtype
    assert bool(jnp.array_equal(y2, ref2))

    print("KERNEL_OK")
</pallas_src>

<mosaic_0001>
module attributes {stable_mosaic.version = 11 : i64} {
  func.func @_copy_kernel(%arg0: i32, %arg1: memref<1x2048xf32, #tpu.memory_space<vmem>>, %arg2: memref<1x2048xf32, #tpu.memory_space<vmem>>) attributes {dimension_semantics = [#tpu.dimension_semantics<parallel>], iteration_bounds = array<i64: 1>, scalar_prefetch = 0 : i64, scratch_operands = 0 : i64, tpu.core_type = #tpu.core_type<tc>, window_params = [{transform_indices = @transform_0, window_bounds = array<i64: 1, 2048>}, {transform_indices = @transform_1, window_bounds = array<i64: 1, 2048>}]} {
    %c0 = arith.constant 0 : index
    %c0_0 = arith.constant 0 : index
    %0 = vector.load %arg1[%c0, %c0_0] : memref<1x2048xf32, #tpu.memory_space<vmem>>, vector<1x2048xf32>
    %c0_1 = arith.constant 0 : index
    %c0_2 = arith.constant 0 : index
    %1 = vector.load %arg2[%c0_1, %c0_2] : memref<1x2048xf32, #tpu.memory_space<vmem>>, vector<1x2048xf32>
    tpu.vector_store %arg2[%c0_1, %c0_2], %0 {strides = array<i32>} : memref<1x2048xf32, #tpu.memory_space<vmem>>, vector<1x2048xf32>,
    return
  }
  func.func @transform_0(%arg0: i32) -> (i32, i32) {
    %c0_i32 = arith.constant 0 : i32
    %c0_i32_0 = arith.constant 0 : i32
    return %arg0, %c0_i32 : i32, i32
  }
  func.func @transform_1(%arg0: i32) -> (i32, i32) {
    %c0_i32 = arith.constant 0 : i32
    %c0_i32_0 = arith.constant 0 : i32
    return %arg0, %c0_i32 : i32, i32
  }
}

</mosaic_0001>

<bundles_post_ra>
// kernel: tpu_custom_call.1
= control target key start
LH: loop header
LB: loop body
LE: loop exit
PB: predicated region body
PF: predicated region fallthrough
CT: control target
= control target key end

     0   :  { %6 = vsyncpa [#allocation3], 0  ;;  %s126_s0 = inlined_call_operand.hbm [shape: f32[1,2048], index: 0, kind: input, shape index: {}]   ;;  %s127_s1 = inlined_call_operand.hbm [shape: f32[1,2048], index: 1, kind: output, shape index: {}]  }
   0x1   :  { %7 = vsyncpa [#allocation4], 0  ;;  %s90_s6 = smov [#allocation2]   ;;  %s42_s10 = scalar_lea.hbm %s126_s0, 256 }
   0x2   :  { %s14_s7 = sshll.u32 %s90_s6, 4  ;;  %p43_p0 = scmp.ne.s32.totalorder %s126_s0, %s42_s10  ;;  %s15_s7 = int_to_ptr.vmem [resolvable:$true] %s14_s7 }
   0x3   :  { %p46_p1 = scmp.lt.u32.totalorder %s42_s10, %s126_s0 }
   0x5   :  { %p48_p2 = pnand %p46_p1, %p43_p0 }
   0x7   :  { %51 = shalt.err (!%p48_p2)
}
   0x8   :  { %s52_s15 = scalar_lea.vmem %s15_s7, 256  ;;  %p57_p4 = scmp.lt.s32.totalorder %s15_s7, %s15_s7 }
   0x9   :  { %p53_p3 = scmp.ne.s32.totalorder %s15_s7, %s52_s15  ;;  %p58_p5 = scmp.lt.s32.totalorder %s52_s15, %s52_s15 }
   0xb   :  { %p59_p6 = por %p58_p5, %p57_p4 }
   0xd   :  { %p60_p7 = pnand %p59_p6, %p53_p3 }
   0xf   :  { %63 = shalt.err (!%p60_p7)
}
  0x10   :  { %17 = dma.hbm_to_vmem [thread:$0]  %s126_s0, 256, %s15_s7, [#allocation3]  }
  0x11   :  { %86 = dma.done.wait [#allocation3], 256  }
  0x12   :  { %87 = vsyncadd [#allocation3], 4294967040  ;;  %s91_s18 = smov [#allocation5]   ;;  %v21_v0 = vld [vmem:[#allocation2] sm:$0xff]  ;;  %v22_v1 = vld [vmem:[#allocation2 + $0x8] sm:$0xff] }
  0x13   :  { %s31_s19 = sshll.u32 %s91_s18, 4  ;;  %23 = vst [vmem:[#allocation5] sm:$0xff] %v21_v0  ;;  %24 = vst [vmem:[#allocation5 + $0x8] sm:$0xff] %v22_v1  ;;  %s32_s19 = int_to_ptr.vmem [resolvable:$true] %s31_s19 }
  0x14   :  { %s64_s20 = scalar_lea.vmem %s32_s19, 256  ;;  %p69_p9 = scmp.lt.s32.totalorder %s32_s19, %s32_s19 }
  0x15   :  { %p65_p8 = scmp.ne.s32.totalorder %s32_s19, %s64_s20  ;;  %p70_p10 = scmp.lt.s32.totalorder %s64_s20, %s64_s20 }
  0x17   :  { %p71_p11 = por %p70_p10, %p69_p9 }
  0x19   :  { %p72_p12 = pnand %p71_p11, %p65_p8 }
  0x1b   :  { %75 = shalt.err (!%p72_p12)
}
  0x1c   :  { %s76_s0 = scalar_lea.hbm %s127_s1, 256 }
  0x1d   :  { %p77_p13 = scmp.ne.s32.totalorder %s127_s1, %s76_s0  ;;  %p80_p0 = scmp.lt.u32.totalorder %s76_s0, %s127_s1 }
  0x1f   :  { %p82_p1 = pnand %p80_p0, %p77_p13 }
  0x21   :  { %85 = shalt.err (!%p82_p1)
}
  0x22   :  { %34 = dma.vmem_to_hbm [thread:$0]  %s32_s19, 256, %s127_s1, [#allocation4]  }
  0x23   :  { %88 = dma.done.wait [#allocation4], 256  }
  0x24   :  { %89 = vsyncadd [#allocation4], 4294967040 }
  0x25   :  { %38 = vsyncpa [#allocation3], 1 }
  0x26   :  { %39 = vsyncpa [#allocation4], 1 }

</bundles_post_ra>
